<compile_context>
chip_gen: v7x
topology: tpu7x:2x2x1
jax: 0.10.0
libtpu: 0.0.40
codegen_flags: <defaults>
</compile_context>

<pallas_src>
import jax
import jax.numpy as jnp
from jax.experimental import pallas as pl
from jax.experimental.pallas import tpu as pltpu

EPS = 1e-3  # matches BatchNorm2d(..., eps=0.001)


def bn_relu_kernel(x_ref, gamma_ref, beta_ref, o_ref):
    # x_ref:  (C_BLK, M) with M = N*H*W  (M on lanes, channels on sublanes)
    # gamma_ref / beta_ref: (C_BLK, 1)
    # o_ref:  (C_BLK, M)
    x = x_ref[...].astype(jnp.float32)
    inv_count = 1.0 / x.shape[1]

    # Two-pass, numerically stable per-channel stats (single reduce call each,
    # both reduce over the lane axis only).
    mean = jnp.sum(x, axis=1, keepdims=True) * inv_count          # (C_BLK, 1)
    xc = x - mean
    var = jnp.sum(xc * xc, axis=1, keepdims=True) * inv_count     # (C_BLK, 1)
    inv_std = jax.lax.rsqrt(var + EPS)

    # Fold BN affine into a single per-channel scale; one fused FMA + ReLU,
    # one store.
    scale = gamma_ref[...] * inv_std                               # (C_BLK, 1)
    o_ref[...] = jnp.maximum(xc * scale + beta_ref[...], 0.0).astype(o_ref.dtype)


def _pick_c_block(c):
    # Largest convenient channel tile that is a multiple of 8 and divides C.
    for cb in (32, 24, 16, 8):
        if c % cb == 0:
            return cb
    return c  # fall back to a single full-channel block (still a valid spec)


def batchnorm_relu(x_nchw, gamma, beta):
    """x_nchw: (N, C, H, W) float32. gamma, beta: (C,). Returns (N, C, H, W)."""
    n, c, h, w = x_nchw.shape
    m = n * h * w

    # (N, C, H, W) -> (C, N*H*W).  For N == 1 this is a free reshape.
    x2d = jnp.transpose(x_nchw, (1, 0, 2, 3)).reshape(c, m)
    g2d = gamma.reshape(c, 1).astype(jnp.float32)
    b2d = beta.reshape(c, 1).astype(jnp.float32)

    c_blk = _pick_c_block(c)
    grid = (c // c_blk,)

    # Note: input_output_aliases={0: 0} would be safe here (disjoint channel
    # tiles per step) but only pays off under jit with buffer donation, so it
    # is omitted for clarity.
    out2d = pl.pallas_call(
        bn_relu_kernel,
        out_shape=jax.ShapeDtypeStruct((c, m), x2d.dtype),
        grid=grid,
        in_specs=[
            pl.BlockSpec((c_blk, m), lambda i: (i, 0)),
            pl.BlockSpec((c_blk, 1), lambda i: (i, 0)),
            pl.BlockSpec((c_blk, 1), lambda i: (i, 0)),
        ],
        out_specs=pl.BlockSpec((c_blk, m), lambda i: (i, 0)),
        compiler_params=pltpu.CompilerParams(
            dimension_semantics=("parallel",),
        ),
    )(x2d, g2d, b2d)

    # (C, N*H*W) -> (N, C, H, W).  Free again for N == 1.
    return jnp.transpose(out2d.reshape(c, n, h, w), (1, 0, 2, 3))


def reference(x_nchw, gamma, beta):
    mean = jnp.mean(x_nchw, axis=(0, 2, 3), keepdims=True)
    var = jnp.mean((x_nchw - mean) ** 2, axis=(0, 2, 3), keepdims=True)
    y = (x_nchw - mean) / jnp.sqrt(var + EPS)
    y = y * gamma.reshape(1, -1, 1, 1) + beta.reshape(1, -1, 1, 1)
    return jnp.maximum(y, 0.0)


if __name__ == "__main__":
    key = jax.random.PRNGKey(0)
    kx, kg, kb = jax.random.split(key, 3)

    N, C, H, W = 1, 72, 28, 28  # matches the module's x30 shape
    x = jax.random.normal(kx, (N, C, H, W), dtype=jnp.float32)
    # BatchNorm2d default init is gamma=1, beta=0; perturb deterministically so
    # the affine path is exercised.
    gamma = 1.0 + 0.1 * jax.random.normal(kg, (C,), dtype=jnp.float32)
    beta = 0.1 * jax.random.normal(kb, (C,), dtype=jnp.float32)

    out = batchnorm_relu(x, gamma, beta)
    out = jax.block_until_ready(out)

    ref = reference(x, gamma, beta)
    assert out.shape == (N, C, H, W)
    assert jnp.allclose(out, ref, atol=1e-4, rtol=1e-4), "mismatch vs reference"

    print("KERNEL_OK")
</pallas_src>

<mosaic_0001>
module attributes {stable_mosaic.version = 11 : i64} {
  func.func @bn_relu_kernel(%arg0: i32, %arg1: memref<24x784xf32, #tpu.memory_space<vmem>>, %arg2: memref<24x1xf32, #tpu.memory_space<vmem>>, %arg3: memref<24x1xf32, #tpu.memory_space<vmem>>, %arg4: memref<24x784xf32, #tpu.memory_space<vmem>>) attributes {dimension_semantics = [#tpu.dimension_semantics<parallel>], iteration_bounds = array<i64: 3>, scalar_prefetch = 0 : i64, scratch_operands = 0 : i64, tpu.core_type = #tpu.core_type<tc>, window_params = [{transform_indices = @transform_0, window_bounds = array<i64: 24, 784>}, {transform_indices = @transform_1, window_bounds = array<i64: 24, 1>}, {transform_indices = @transform_2, window_bounds = array<i64: 24, 1>}, {transform_indices = @transform_3, window_bounds = array<i64: 24, 784>}]} {
    %c0 = arith.constant 0 : index
    %c0_0 = arith.constant 0 : index
    %0 = vector.load %arg1[%c0, %c0_0] : memref<24x784xf32, #tpu.memory_space<vmem>>, vector<24x784xf32>
    %cst = arith.constant dense<0.000000e+00> : vector<24xf32>
    %1 = vector.multi_reduction <add>, %0, %cst [1] : vector<24x784xf32> to vector<24xf32>
    %2 = vector.shape_cast %1 : vector<24xf32> to vector<24x1xf32>
    %cst_1 = arith.constant 0.00127551018 : f32
    %3 = vector.broadcast %cst_1 : f32 to vector<24x1xf32>
    %4 = arith.mulf %2, %3 : vector<24x1xf32>
    %5 = vector.broadcast %4 : vector<24x1xf32> to vector<24x784xf32>
    %6 = arith.subf %0, %5 : vector<24x784xf32>
    %7 = arith.mulf %6, %6 : vector<24x784xf32>
    %cst_2 = arith.constant dense<0.000000e+00> : vector<24xf32>
    %8 = vector.multi_reduction <add>, %7, %cst_2 [1] : vector<24x784xf32> to vector<24xf32>
    %9 = vector.shape_cast %8 : vector<24xf32> to vector<24x1xf32>
    %cst_3 = arith.constant 0.00127551018 : f32
    %10 = vector.broadcast %cst_3 : f32 to vector<24x1xf32>
    %11 = arith.mulf %9, %10 : vector<24x1xf32>
    %cst_4 = arith.constant 1.000000e-03 : f32
    %12 = vector.broadcast %cst_4 : f32 to vector<24x1xf32>
    %13 = arith.addf %11, %12 : vector<24x1xf32>
    %14 = math.rsqrt %13 : vector<24x1xf32>
    %c0_5 = arith.constant 0 : index
    %c0_6 = arith.constant 0 : index
    %15 = vector.load %arg2[%c0_5, %c0_6] : memref<24x1xf32, #tpu.memory_space<vmem>>, vector<24x1xf32>
    %16 = arith.mulf %15, %14 : vector<24x1xf32>
    %17 = vector.broadcast %16 : vector<24x1xf32> to vector<24x784xf32>
    %18 = arith.mulf %6, %17 : vector<24x784xf32>
    %c0_7 = arith.constant 0 : index
    %c0_8 = arith.constant 0 : index
    %19 = vector.load %arg3[%c0_7, %c0_8] : memref<24x1xf32, #tpu.memory_space<vmem>>, vector<24x1xf32>
    %20 = vector.broadcast %19 : vector<24x1xf32> to vector<24x784xf32>
    %21 = arith.addf %18, %20 : vector<24x784xf32>
    %cst_9 = arith.constant 0.000000e+00 : f32
    %22 = vector.broadcast %cst_9 : f32 to vector<24x784xf32>
    %23 = arith.maximumf %21, %22 : vector<24x784xf32>
    %c0_10 = arith.constant 0 : index
    %c0_11 = arith.constant 0 : index
    %24 = vector.load %arg4[%c0_10, %c0_11] : memref<24x784xf32, #tpu.memory_space<vmem>>, vector<24x784xf32>
    tpu.vector_store %arg4[%c0_10, %c0_11], %23 {strides = array<i32>} : memref<24x784xf32, #tpu.memory_space<vmem>>, vector<24x784xf32>,
    return
  }
  func.func @transform_0(%arg0: i32) -> (i32, i32) {
    %c0_i32 = arith.constant 0 : i32
    %c0_i32_0 = arith.constant 0 : i32
    return %arg0, %c0_i32 : i32, i32
  }
  func.func @transform_1(%arg0: i32) -> (i32, i32) {
    %c0_i32 = arith.constant 0 : i32
    %c0_i32_0 = arith.constant 0 : i32
    return %arg0, %c0_i32 : i32, i32
  }
  func.func @transform_2(%arg0: i32) -> (i32, i32) {
    %c0_i32 = arith.constant 0 : i32
    %c0_i32_0 = arith.constant 0 : i32
    return %arg0, %c0_i32 : i32, i32
  }
  func.func @transform_3(%arg0: i32) -> (i32, i32) {
    %c0_i32 = arith.constant 0 : i32
    %c0_i32_0 = arith.constant 0 : i32
    return %arg0, %c0_i32 : i32, i32
  }
}

</mosaic_0001>

<bundles_post_ra>
// kernel: tpu_custom_call.1
= control target key start
LH: loop header
LB: loop body
LE: loop exit
PB: predicated region body
PF: predicated region fallthrough
CT: control target
= control target key end

     0   :  { %8 = vsyncpa [#allocation3], 0  ;;  %s1150_s0 = inlined_call_operand.hbm [shape: f32[72,784], index: 0, kind: input, shape index: {}]   ;;  %s1151_s1 = inlined_call_operand.vmem [shape: f32[72,1], index: 1, kind: input, shape index: {}]   ;;  %s1152_s2 = inlined_call_operand.vmem [shape: f32[72,1], index: 2, kind: input, shape index: {}]   ;;  %s1153_s3 = inlined_call_operand.hbm [shape: f32[72,784], index: 3, kind: output, shape index: {}]  }
   0x1   :  { %10 = vsyncpa [#allocation3 + $0x1], 0 }
   0x2   :  { %11 = vsyncpa [#allocation4], 0 }
   0x3   :  { %13 = vsyncpa [#allocation4 + $0x1], 0  ;;  %s801_s12 = smov 0   ;;  %s803_s13 = smov 0  }
   0x4   :  { %s805_s14 = smov 0   ;;  %s807_s15 = smov 0  }
   0x5 LB: > { %s822_s16 = sadd.s32 4294967295, %s772_s15   ;;  %s601_s17 = sadd.s32 4294967294, %s772_s15   ;;  %s772_s15 = sphi %s807_s15, %s1165_s15   ;;  %s768_s14 = sphi %s805_s14, %s1164_s14   ;;  %s764_s13 = sphi %s803_s13, %s1163_s13   ;;  %s760_s12 = sphi %s801_s12, %s1162_s12  }
   0x6   : > { %s826_s18 = sadd.s32 1, %s772_s15   ;;  %s26_s19 = sadd.s32 1, %s768_s14 }
   0x7   : > { %s23_s20 = ssub.s32 %s772_s15, %s826_s18  ;;  %p33_p0 = scmp.ne.s32.totalorder %s768_s14, %s764_s13 }
   0x8   : > { %p24_p1 = scmp.eq.s32.totalorder %s23_s20, 0  ;;  %p34_p2 = scmp.eq.s32.totalorder %s772_s15, 0 }
   0x9   : > { %p39_p3 = scmp.ne.s32.totalorder %s764_s13, %s760_s12  ;;  %p40_p4 = scmp.eq.s32.totalorder %s822_s16, 0 }
   0xa   : > { %s838_s21 = scalar_select %p24_p1, %s768_s14, %s26_s19  }
   0xb   : > { %p35_p5 = por %p34_p2, %p33_p0  ;;  %p840_p6 = por %p40_p4, %p39_p3 }
   0xc   : > { %p115_p7 = scmp.eq.s32.totalorder %s822_s16, 2  ;;  %p121_p8 = scmp.eq.s32.totalorder %s601_s17, 2 }
   0xd   : > { %p627_p9 = scmp.lt.s32.totalorder %s772_s15, 3  ;;  %s141_s25 = sand.u32 1, %s768_s14  }
   0xe   : > { %p846_p10 = por %p115_p7, %p33_p0  ;;  %p850_p11 = por %p121_p8, %p39_p3 }
   0xf   : > { %s611_s26 = smul.u32 168, %s141_s25  ;;  %p856_p12 = pnand %p627_p9, %p35_p5 }
  0x10   : > { %s1156_s23 = scalar_select %p846_p10, 1, 0 }
  0x11   : > { %s1157_s24 = scalar_select %p850_p11, 1, 0 }
  0x12   : > { %s628_s27 = smul.u32 2688, %s772_s15  ;;  %s145_s5 = scalar_lea.vmem [#allocation2], %s611_s26 }
  0x13   : > { %s153_s6 = sshll.u32 %s145_s5, 4  ;;  %s868_s7 = scalar_lea.sflag [#allocation3], %s141_s25  ;;  %s865_s6 = int_to_ptr.vmem [resolvable:$true] %s153_s6 }
  0x14   : > { %s863_s4 = scalar_lea.hbm %s1150_s0, %s628_s27  ;;  %p678_p1 = pneg %p856_p12 }
  0x15   : > { %s676_s8 = scalar_lea.hbm %s863_s4, 2688  ;;  %s681_s11 = scalar_lea.hbm %s1150_s0, 8064 }
  0x16   : > { %p677_p0 = scmp.ne.s32.totalorder %s863_s4, %s676_s8  ;;  %p682_p4 = scmp.lt.u32.totalorder %s863_s4, %s1150_s0 }
  0x17   : > { %p683_p5 = scmp.lt.u32.totalorder %s681_s11, %s676_s8  ;;  %p685_p8 = scmp.lt.u32.totalorder %s676_s8, %s863_s4 }
  0x18   : > { %p679_p2 = pnand %p678_p1, %p677_p0 }
  0x19   : > { %p684_p7 = por %p683_p5, %p682_p4 }
  0x1a   : > { %p680_p3 = pneg %p679_p2 }
  0x1b   : > { %p686_p9 = por %p685_p8, %p684_p7 }
  0x1d   : > { %p687_p13 = pnand %p686_p9, %p680_p3 }
  0x1f   : > { %690 = shalt.err (!%p687_p13)
}
  0x20   : > { %s691_s20 = scalar_lea.vmem %s865_s6, 2688  ;;  %s774_s25 = smov [#allocation2]  }
  0x21   : > { %p692_p0 = scmp.ne.s32.totalorder %s865_s6, %s691_s20  ;;  %s696_s26 = sshll.u32 %s774_s25, 4  ;;  %s697_s26 = int_to_ptr.vmem [resolvable:$false] %s696_s26 }
  0x22   : > { %s698_s27 = scalar_lea.vmem %s697_s26, 5376  ;;  %p699_p10 = scmp.lt.s32.totalorder %s865_s6, %s697_s26 }
  0x23   : > { %p694_p2 = pnand %p692_p0, %p678_p1  ;;  %p700_p4 = scmp.lt.s32.totalorder %s698_s27, %s691_s20 }
  0x25   : > { %p695_p11 = pneg %p694_p2  ;;  %p701_p5 = por %p700_p4, %p699_p10 }
  0x27   : > { %p702_p7 = pnand %p701_p5, %p695_p11 }
  0x29   : > { %705 = shalt.err (!%p702_p7)
}
  0x2a   : > { %s775_s29 = smov 896   ;;  %s776_s30 = smov 56  }
  0x2b   : > { %622 = dma.hbm_to_vmem [thread:$0]  (!%p856_p12), %s863_s4, 2688, %s865_s6, %s868_s7, %s775_s29, %s775_s29, %s776_s30  }
  0x2c   : > { %p179_p13 = scmp.lt.s32.totalorder %s772_s15, 4  ;;  %p1159_p1 = scmp.ge.s32.totalorder %s772_s15, 1 }
  0x2e   : > { %p180_p3 = pnand %p1159_p1, %p179_p13 }
  0x2f   : > { %s900_s5 = sand.u32 (!%p180_p3), 1, %s764_s13  }
  0x30   : > { %183 = sbr.rel (%p180_p3) target bundleno = 554 (0x22a), region = 32  ;;  %s186_s9 = scalar_lea.sflag (!%p180_p3), [#allocation3], %s900_s5 }
  0x31   : > { %s613_s8 = smul.u32 (!%p180_p3), 168, %s900_s5 }
  0x33   : > { %s906_s10 = scalar_lea.vmem (!%p180_p3), [#allocation2], %s613_s8 }
  0x37   : > { %751 = dma.done.wait (%p840_p6), %s186_s9, 2688  }
  0x38   : > { %753 = vsyncadd (%p840_p6), %s186_s9, 4294964608  ;;  %v250_v0 = vld [vmem:[%s906_s10 + $0x70] sm:$0xff]  ;;  %v251_v1 = vld [vmem:[%s906_s10 + $0x78] sm:$0xff]  ;;  %vm262_vm0 = vcmask 130048   ;;  %s223_s22 = smul.u32 3, %s822_s16  ;;  %s1060_s20 = scalar_lea.vmem [#allocation5], %s613_s8 }
  0x39   : > { %v252_v2 = vld [vmem:[%s906_s10 + $0x80] sm:$0xff]  ;;  %v276_v3 = vadd.f32 %v251_v1, %v250_v0  ;;  %v253_v4 = vld [vmem:[%s906_s10 + $0x88] sm:$0xff]  ;;  %v238_v8 = vld [vmem:[%s906_s10 + $0x10] sm:$0xff]  ;;  %s629_s25 = smul.u32 2688, %s822_s16  ;;  %s504_s26 = sshll.u32 %s1060_s20, 4  ;;  %s1099_s26 = int_to_ptr.vmem [resolvable:$true] %s504_s26 }
  0x3a   : > { %v236_v5 = vld [vmem:[%s906_s10] sm:$0xff]  ;;  %v237_v6 = vld [vmem:[%s906_s10 + $0x8] sm:$0xff]  ;;  %v254_v10 = vld [vmem:[%s906_s10 + $0x90] sm:$0xff]  ;;  %p224_p6 = scmp.lt.s32.totalorder %s223_s22, 8  ;;  %s490_s30 = scalar_lea.sflag [#allocation4], %s900_s5 }
  0x3b   : > { %v277_v7 = vadd.f32 %v276_v3, %v252_v2  ;;  %v257_v9 = vadd.f32 %v237_v6, %v236_v5  ;;  %v239_v11 = vld [vmem:[%s906_s10 + $0x18] sm:$0xff]  ;;  %v925_v13 = vld [vmem:[%s906_s10 + $0xa0] sm:$0xff]  ;;  %v245_v17 = vld [vmem:[%s906_s10 + $0x48] sm:$0xff]  ;;  %s1097_s29 = scalar_lea.hbm %s1153_s3, %s629_s25  ;;  %s706_s8 = scalar_lea.vmem %s1099_s26, 2688 }
  0x3c   : > { %v922_v12 = vld [vmem:[%s906_s10 + $0x38] sm:$0xff]  ;;  %v244_v16 = vld [vmem:[%s906_s10 + $0x40] sm:$0xff]  ;;  %v242_v22 = vld [vmem:[%s906_s10 + $0x30] sm:$0xff]  ;;  %v281_v25 = vsel %vm262_vm0, %v925_v13, 0.0  ;;  %s1167_s22 = smov (!%p224_p6, %s223_s22), 8  ;;  %p707_p10 = scmp.ne.s32.totalorder %s1099_s26, %s706_s8 }
  0x3d   : > { %v278_v14 = vadd.f32 %v277_v7, %v253_v4  ;;  %v258_v15 = vadd.f32 %v257_v9, %v238_v8  ;;  %v255_v18 = vld [vmem:[%s906_s10 + $0x98] sm:$0xff]  ;;  %v240_v19 = vld [vmem:[%s906_s10 + $0x20] sm:$0xff]  ;;  %v267_v20 = vadd.f32 %v244_v16, %v922_v12  ;;  %v246_v24 = vld [vmem:[%s906_s10 + $0x50] sm:$0xff]  ;;  %v263_v31 = vsel %vm262_vm0, %v242_v22, 0.0  ;;  %s606_s28 = sshll.u32 %s1167_s22, 3  ;;  %p1160_p11 = scmp.ne.s32.totalorder %s1156_s23, 0 }
  0x3e   : > { %v241_v26 = vld [vmem:[%s906_s10 + $0x28] sm:$0xff]  ;;  %v247_v30 = vld [vmem:[%s906_s10 + $0x58] sm:$0xff]  ;;  %v943_v36 = vld [vmem:[%s906_s10 + $0x60] sm:$0xff]  ;;  %s1043_s7 = scalar_lea.vmem %s1152_s2, %s606_s28  ;;  %s227_s19 = scalar_lea.vmem %s1151_s1, %s606_s28 }
  0x3f   : > { %v279_v21 = vadd.f32 %v278_v14, %v254_v10  ;;  %v259_v23 = vadd.f32 %v258_v15, %v239_v11  ;;  %v268_v27 = vadd.f32 %v267_v20, %v245_v17  ;;  %v940_v32 = vld [vmem:[%s906_s10 + $0x68] sm:$0xff]  ;;  %p708_p12 = pnand %p707_p10, %p1160_p11  ;;  %s778_s9 = smov [#allocation5]  }
  0x40   : > { %v272_v39 = vsel %vm262_vm0, %v940_v32, 0.0  ;;  %s710_s10 = sshll.u32 %s778_s9, 4  ;;  %s711_s10 = int_to_ptr.vmem [resolvable:$false] %s710_s10 }
  0x41   : > { %v280_v28 = vadd.f32 %v279_v21, %v255_v18  ;;  %v260_v29 = vadd.f32 %v259_v23, %v240_v19  ;;  %v269_v33 = vadd.f32 %v268_v27, %v246_v24  ;;  %p709_p8 = pneg %p708_p12  ;;  %s712_s22 = scalar_lea.vmem %s711_s10, 5376 }
  0x42   : > { %p713_p9 = scmp.lt.s32.totalorder %s1099_s26, %s711_s10  ;;  %p714_p0 = scmp.lt.s32.totalorder %s712_s22, %s706_s8 }
  0x43   : > { %v282_v34 = vadd.f32 %v281_v25, %v280_v28  ;;  %v261_v35 = vadd.f32 %v260_v29, %v241_v26  ;;  %v270_v37 = vadd.f32 %v269_v33, %v247_v30 }
  0x44   : > { %p715_p2 = por %p714_p0, %p713_p9 }
  0x45   : > { %283 = vadd.xlane.f32.xlu1 %v282_v34  ;;  %v264_v38 = vadd.f32 %v263_v31, %v261_v35  ;;  %v271_v40 = vadd.f32 %v270_v37, %v943_v36 }
  0x46   : > { %p716_p4 = pnand %p715_p2, %p709_p8 }
  0x47   : > { %265 = vadd.xlane.f32.xlu0 %v264_v38  ;;  %v273_v41 = vadd.f32 %v272_v39, %v271_v40 }
  0x4b   : > { %274 = vadd.xlane.f32.xlu0 %v273_v41 }
  0xd2   : > { %v284_v42 = vpop.xlane.xlu1 %283 }
  0xd3   : > { %v287_v43 = vmul.f32 0.0012755102, %v284_v42 }
  0xd4   : > { %v266_v44 = vpop.xlane.xlu0 %265 }
  0xd5   : > { %v285_v45 = vmul.f32 0.0012755102, %v266_v44  ;;  %v948_v46 = vsub.f32 %v250_v0, %v287_v43  ;;  %v950_v47 = vsub.f32 %v251_v1, %v287_v43  ;;  %v958_v51 = vsub.f32 %v252_v2, %v287_v43 }
  0xd6   : > { %v962_v54 = vsub.f32 %v253_v4, %v287_v43  ;;  %v972_v60 = vsub.f32 %v254_v10, %v287_v43  ;;  %v974_v61 = vsub.f32 %v255_v18, %v287_v43  ;;  %v996_v10 = vsub.f32 %v925_v13, %v287_v43 }
  0xd7   : > { %v952_v48 = vsub.f32 %v236_v5, %v285_v45  ;;  %v954_v49 = vsub.f32 %v237_v6, %v285_v45  ;;  %v956_v50 = vsub.f32 %v238_v8, %v285_v45  ;;  %v960_v53 = vsub.f32 %v239_v11, %v285_v45 }
  0xd8   : > { %v275_v52 = vpop.xlane.xlu0 %274  ;;  %v323_v58 = vmul.f32 %v948_v46, %v948_v46  ;;  %v970_v59 = vsub.f32 %v240_v19, %v285_v45  ;;  %v324_v0 = vmul.f32 %v950_v47, %v950_v47  ;;  %v325_v1 = vmul.f32 %v958_v51, %v958_v51 }
  0xd9   : > { %v286_v55 = vmul.f32 0.0012755102, %v275_v52  ;;  %v309_v56 = vmul.f32 %v952_v48, %v952_v48  ;;  %v310_v57 = vmul.f32 %v954_v49, %v954_v49  ;;  %v311_v62 = vmul.f32 %v956_v50, %v956_v50 }
  0xda   : > { %v982_v2 = vsub.f32 %v241_v26, %v285_v45  ;;  %v984_v3 = vsub.f32 %v242_v22, %v285_v45  ;;  %v312_v4 = vmul.f32 %v960_v53, %v960_v53  ;;  %v326_v5 = vmul.f32 %v962_v54, %v962_v54 }
  0xdb   : > { %v330_v63 = vadd.f32 %v310_v57, %v309_v56  ;;  %v348_v7 = vadd.f32 %v324_v0, %v323_v58  ;;  %v991_v8 = vsub.f32 %v922_v12, %v286_v55  ;;  %v993_v9 = vsub.f32 %v244_v16, %v286_v55  ;;  %v408_v56 = vld [vmem:[%s1043_s7] sm:$0xff]  ;;  %v409_v57 = vld [vmem:[%s1043_s7 + $0x8] sm:$0xff] }
  0xdc   : > { %v998_v11 = vsub.f32 %v245_v17, %v286_v55  ;;  %v313_v14 = vmul.f32 %v970_v59, %v970_v59  ;;  %v327_v18 = vmul.f32 %v972_v60, %v972_v60  ;;  %v315_v20 = vmul.f32 %v984_v3, %v984_v3 }
  0xdd   : > { %v331_v6 = vadd.f32 %v330_v63, %v311_v62  ;;  %v349_v19 = vadd.f32 %v348_v7, %v325_v1  ;;  %v1006_v12 = vsub.f32 %v246_v24, %v286_v55  ;;  %v316_v16 = vmul.f32 %v991_v8, %v991_v8 }
  0xde   : > { %v317_v13 = vmul.f32 %v993_v9, %v993_v9  ;;  %v314_v17 = vmul.f32 %v982_v2, %v982_v2  ;;  %v328_v22 = vmul.f32 %v974_v61, %v974_v61  ;;  %v329_v25 = vmul.f32 %v996_v10, %v996_v10 }
  0xdf   : > { %v332_v15 = vadd.f32 %v331_v6, %v312_v4  ;;  %v350_v23 = vadd.f32 %v349_v19, %v326_v5  ;;  %v1018_v26 = vsub.f32 %v247_v30, %v286_v55  ;;  %v318_v24 = vmul.f32 %v998_v11, %v998_v11  ;;  %v367_v19 = vld [vmem:[%s227_s19 + $0x8] sm:$0xff] }
  0xe0   : > { %v339_v27 = vadd.f32 %v317_v13, %v316_v16  ;;  %v1023_v31 = vsub.f32 %v940_v32, %v286_v55  ;;  %v335_v33 = vsel %vm262_vm0, %v315_v20, 0.0  ;;  %v1027_v34 = vsub.f32 %v943_v36, %v286_v55 }
  0xe1   : > { %v333_v21 = vadd.f32 %v332_v15, %v313_v14  ;;  %v351_v29 = vadd.f32 %v350_v23, %v327_v18  ;;  %v319_v35 = vmul.f32 %v1006_v12, %v1006_v12  ;;  %v353_v39 = vsel %vm262_vm0, %v329_v25, 0.0  ;;  %v366_v14 = vld [vmem:[%s227_s19] sm:$0xff] }
  0xe2   : > { %v340_v37 = vadd.f32 %v339_v27, %v318_v24  ;;  %v320_v40 = vmul.f32 %v1018_v26, %v1018_v26  ;;  %v322_v32 = vmul.f32 %v1023_v31, %v1023_v31  ;;  %v321_v36 = vmul.f32 %v1027_v34, %v1027_v34 }
  0xe3   : > { %v334_v28 = vadd.f32 %v333_v21, %v314_v17  ;;  %v352_v38 = vadd.f32 %v351_v29, %v328_v22  ;;  %v777_v55 = vmov 0   ;;  %v368_v17 = vld [vmem:[%s227_s19 + $0x10] sm:$0xff] }
  0xe4   : > { %v341_v41 = vadd.f32 %v340_v37, %v319_v35  ;;  %v344_v45 = vsel %vm262_vm0, %v322_v32, 0.0  ;;  %669 = vset.pattern.permute.xlu1 %v777_v55  ;;  %668 = vset.pattern.permute.xlu0 %v777_v55  ;;  %v410_v22 = vld [vmem:[%s1043_s7 + $0x10] sm:$0xff] }
  0xe5   : > { %v336_v30 = vadd.f32 %v335_v33, %v334_v28  ;;  %v354_v43 = vadd.f32 %v353_v39, %v352_v38 }
  0xe6   : > { %v342_v42 = vadd.f32 %v341_v41, %v320_v40 }
  0xe7   : > { %337 = vadd.xlane.f32.xlu1 %v336_v30 }
  0xe8   : > { %v343_v44 = vadd.f32 %v342_v42, %v321_v36 }
  0xea   : > { %v345_v52 = vadd.f32 %v344_v45, %v343_v44 }
  0xeb   : > { %355 = vadd.xlane.f32.xlu1 %v354_v43 }
  0xec   : > { %346 = vadd.xlane.f32.xlu0 %v345_v52 }
  0xfc   : > { %413 = vperm.xlu1 %669, %v408_v56  }
 0x100   : > { %418 = vperm.xlu1 %669, %v409_v57  }
 0x174   : > { %v338_v58 = vpop.xlane.xlu1 %337 }
 0x175   : > { %v357_v62 = vmul.f32 0.0012755102, %v338_v58 }
 0x177   : > { %v360_v63 = vadd.f32 0.001, %v357_v62 }
 0x178   : > { %v356_v0 = vpop.xlane.xlu1 %355 }
 0x179   : > { %670 = vrsqrt.f32 %v360_v63  ;;  %v359_v1 = vmul.f32 0.0012755102, %v356_v0  ;;  %v347_v4 = vpop.xlane.xlu0 %346 }
 0x17a   : > { %v358_v5 = vmul.f32 0.0012755102, %v347_v4 }
 0x17b   : > { %v362_v6 = vadd.f32 0.001, %v359_v1 }
 0x17c   : > { %v361_v7 = vadd.f32 0.001, %v358_v5  ;;  %v414_v23 = vpop.permute.xlu1 %413 }
 0x17e   : > { %672 = vrsqrt.f32 %v361_v7 }
 0x17f   : > { %674 = vrsqrt.f32 %v362_v6 }
 0x180   : > { %v419_v30 = vpop.permute.xlu1 %418 }
 0x183   : > { %v671_v15 = vpop.eup %670 }
 0x184   : > { %v369_v18 = vmul.f32 %v671_v15, %v366_v14 }
 0x186   : > { %374 = vperm.xlu0 %668, %v369_v18  }
 0x188   : > { %v673_v20 = vpop.eup %672 }
 0x189   : > { %v370_v16 = vmul.f32 %v673_v20, %v367_v19  ;;  %v675_v13 = vpop.eup %674 }
 0x18a   : > { %v371_v21 = vmul.f32 %v675_v13, %v368_v17 }
 0x18b   : > { %379 = vperm.xlu1 %669, %v370_v16  }
 0x18f   : > { %384 = vperm.xlu1 %669, %v371_v21  }
 0x193   : > { %423 = vperm.xlu1 %669, %v410_v22  }
 0x205   : > { %v375_v25 = vpop.permute.xlu0 %374 }
 0x206   : > { %v387_v24 = vmul.f32 %v375_v25, %v952_v48  ;;  %v388_v27 = vmul.f32 %v375_v25, %v954_v49  ;;  %v389_v28 = vmul.f32 %v375_v25, %v956_v50  ;;  %v390_v29 = vmul.f32 %v375_v25, %v960_v53 }
 0x207   : > { %v391_v33 = vmul.f32 %v375_v25, %v970_v59  ;;  %v392_v35 = vmul.f32 %v375_v25, %v982_v2  ;;  %v393_v37 = vmul.f32 %v375_v25, %v984_v3 }
 0x208   : > { %v426_v38 = vadd.f32 %v414_v23, %v387_v24  ;;  %v427_v39 = vadd.f32 %v414_v23, %v388_v27  ;;  %v428_v40 = vadd.f32 %v414_v23, %v389_v28  ;;  %v429_v41 = vadd.f32 %v414_v23, %v390_v29 }
 0x209   : > { %v430_v32 = vadd.f32 %v414_v23, %v391_v33  ;;  %v431_v48 = vadd.f32 %v414_v23, %v392_v35  ;;  %v432_v36 = vadd.f32 %v414_v23, %v393_v37 }
 0x20a   : > { %v447_v49 = vmax.f32 %v426_v38, 0.0  ;;  %v448_v42 = vmax.f32 %v427_v39, 0.0  ;;  %v449_v50 = vmax.f32 %v428_v40, 0.0  ;;  %v450_v43 = vmax.f32 %v429_v41, 0.0  ;;  %v380_v2 = vpop.permute.xlu1 %379 }
 0x20b   : > { %v451_v53 = vmax.f32 %v430_v32, 0.0  ;;  %v452_v44 = vmax.f32 %v431_v48, 0.0  ;;  %v453_v59 = vmax.f32 %v432_v36, 0.0  ;;  %v394_v3 = vmul.f32 %v380_v2, %v991_v8 }
 0x20c   : > { %468 = vst [vmem:[%s1060_s20] sm:$0xff] %v447_v49  ;;  %469 = vst [vmem:[%s1060_s20 + $0x8] sm:$0xff] %v448_v42  ;;  %v395_v45 = vmul.f32 %v380_v2, %v993_v9  ;;  %v396_v52 = vmul.f32 %v380_v2, %v998_v11  ;;  %v397_v55 = vmul.f32 %v380_v2, %v1006_v12 }
 0x20d   : > { %470 = vst [vmem:[%s1060_s20 + $0x10] sm:$0xff] %v449_v50  ;;  %471 = vst [vmem:[%s1060_s20 + $0x18] sm:$0xff] %v450_v43  ;;  %v398_v56 = vmul.f32 %v380_v2, %v1018_v26  ;;  %v399_v57 = vmul.f32 %v380_v2, %v1027_v34  ;;  %v400_v58 = vmul.f32 %v380_v2, %v1023_v31 }
 0x20e   : > { %472 = vst [vmem:[%s1060_s20 + $0x20] sm:$0xff] %v451_v53  ;;  %473 = vst [vmem:[%s1060_s20 + $0x28] sm:$0xff] %v452_v44  ;;  %v433_v62 = vadd.f32 %v419_v30, %v394_v3  ;;  %v434_v63 = vadd.f32 %v419_v30, %v395_v45  ;;  %v435_v0 = vadd.f32 %v419_v30, %v396_v52  ;;  %v385_v11 = vpop.permute.xlu1 %384 }
 0x20f   : > { %474 = vst.msk [vmem:[%s1060_s20 + $0x30] sm:$0xff] %vm262_vm0, %v453_v59  ;;  %v436_v8 = vadd.f32 %v419_v30, %v397_v55  ;;  %v437_v1 = vadd.f32 %v419_v30, %v398_v56  ;;  %v438_v9 = vadd.f32 %v419_v30, %v399_v57  ;;  %v439_v4 = vadd.f32 %v419_v30, %v400_v58 }
 0x210   : > { %v454_v12 = vmax.f32 %v433_v62, 0.0  ;;  %v455_v26 = vmax.f32 %v434_v63, 0.0  ;;  %v456_v34 = vmax.f32 %v435_v0, 0.0  ;;  %v401_v14 = vmul.f32 %v385_v11, %v948_v46 }
 0x211   : > { %v457_v31 = vmax.f32 %v436_v8, 0.0  ;;  %v458_v5 = vmax.f32 %v437_v1, 0.0  ;;  %v459_v6 = vmax.f32 %v438_v9, 0.0  ;;  %v460_v7 = vmax.f32 %v439_v4, 0.0 }
 0x212   : > { %475 = vst [vmem:[%s1060_s20 + $0x38] sm:$0xff] %v454_v12  ;;  %476 = vst [vmem:[%s1060_s20 + $0x40] sm:$0xff] %v455_v26  ;;  %v402_v15 = vmul.f32 %v385_v11, %v950_v47  ;;  %v403_v18 = vmul.f32 %v385_v11, %v958_v51  ;;  %v404_v19 = vmul.f32 %v385_v11, %v962_v54  ;;  %v424_v17 = vpop.permute.xlu1 %423 }
 0x213   : > { %477 = vst [vmem:[%s1060_s20 + $0x48] sm:$0xff] %v456_v34  ;;  %478 = vst [vmem:[%s1060_s20 + $0x50] sm:$0xff] %v457_v31  ;;  %v405_v20 = vmul.f32 %v385_v11, %v972_v60  ;;  %v406_v16 = vmul.f32 %v385_v11, %v974_v61  ;;  %v407_v13 = vmul.f32 %v385_v11, %v996_v10 }
 0x214   : > { %479 = vst [vmem:[%s1060_s20 + $0x58] sm:$0xff] %v458_v5  ;;  %480 = vst [vmem:[%s1060_s20 + $0x60] sm:$0xff] %v459_v6  ;;  %v440_v46 = vadd.f32 %v424_v17, %v401_v14  ;;  %v441_v21 = vadd.f32 %v424_v17, %v402_v15  ;;  %v442_v47 = vadd.f32 %v424_v17, %v403_v18 }
 0x215   : > { %481 = vst.msk [vmem:[%s1060_s20 + $0x68] sm:$0xff] %vm262_vm0, %v460_v7  ;;  %v443_v51 = vadd.f32 %v424_v17, %v404_v19  ;;  %v444_v54 = vadd.f32 %v424_v17, %v405_v20  ;;  %v445_v22 = vadd.f32 %v424_v17, %v406_v16  ;;  %v446_v23 = vadd.f32 %v424_v17, %v407_v13 }
 0x216   : > { %v461_v60 = vmax.f32 %v440_v46, 0.0  ;;  %v462_v61 = vmax.f32 %v441_v21, 0.0  ;;  %v463_v10 = vmax.f32 %v442_v47, 0.0 }
 0x217   : > { %v464_v25 = vmax.f32 %v443_v51, 0.0  ;;  %v465_v24 = vmax.f32 %v444_v54, 0.0  ;;  %v466_v27 = vmax.f32 %v445_v22, 0.0  ;;  %v467_v28 = vmax.f32 %v446_v23, 0.0 }
 0x218   : > { %482 = vst [vmem:[%s1060_s20 + $0x70] sm:$0xff] %v461_v60  ;;  %483 = vst [vmem:[%s1060_s20 + $0x78] sm:$0xff] %v462_v61 }
 0x219   : > { %484 = vst [vmem:[%s1060_s20 + $0x80] sm:$0xff] %v463_v10  ;;  %485 = vst [vmem:[%s1060_s20 + $0x88] sm:$0xff] %v464_v25 }
 0x21a   : > { %486 = vst [vmem:[%s1060_s20 + $0x90] sm:$0xff] %v465_v24  ;;  %487 = vst [vmem:[%s1060_s20 + $0x98] sm:$0xff] %v466_v27 }
 0x21b   : > { %488 = vst.msk [vmem:[%s1060_s20 + $0xa0] sm:$0xff] %vm262_vm0, %v467_v28 }
 0x21c   : > { %719 = shalt.err (!%p716_p4)
}
 0x21d   : > { %s720_s28 = scalar_lea.hbm %s1097_s29, 2688  ;;  %s724_s7 = scalar_lea.hbm %s1153_s3, 8064 }
 0x21e   : > { %p721_p5 = scmp.ne.s32.totalorder %s1097_s29, %s720_s28  ;;  %p725_p1 = scmp.lt.u32.totalorder %s1097_s29, %s1153_s3 }
 0x21f   : > { %p726_p3 = scmp.lt.u32.totalorder %s724_s7, %s720_s28  ;;  %p728_p10 = scmp.lt.u32.totalorder %s720_s28, %s1097_s29 }
 0x220   : > { %p722_p7 = pnand %p721_p5, %p1160_p11 }
 0x221   : > { %p727_p6 = por %p726_p3, %p725_p1 }
 0x222   : > { %p723_p13 = pneg %p722_p7 }
 0x223   : > { %p729_p12 = por %p728_p10, %p727_p6 }
 0x225   : > { %p730_p8 = pnand %p729_p12, %p723_p13 }
 0x227   : > { %733 = shalt.err (!%p730_p8)
}
 0x228   : > { %s779_s19 = smov 896   ;;  %s780_s20 = smov 56  }
 0x229   : > { %617 = dma.vmem_to_hbm [thread:$0]  (%p1160_p11), %s1099_s26, 2688, %s1097_s29, %s490_s30, %s779_s19, %s779_s19, %s780_s20  }
 0x22a PF: > { %p630_p9 = scmp.ge.s32.totalorder %s772_s15, 2  ;;  %s519_s25 = sand.u32 1, %s760_s12  }
 0x22b   : > { %p1161_p0 = scmp.ne.s32.totalorder %s1157_s24, 0  ;;  %s520_s16 = scalar_lea.sflag [#allocation4], %s519_s25 }
 0x22d   : > { %p624_p2 = pnand %p630_p9, %p1161_p0 }
 0x22f   : > { %755 = dma.done.wait (!%p624_p2), %s520_s16, 2688  }
 0x230   : > { %757 = vsyncadd (!%p624_p2), %s520_s16, 4294964608  ;;  %p16_p4 = scmp.ge.s32.totalorder %s826_s18, 5   ;;  %s1162_s12 = smov %s764_s13 }
 0x231   : > { %s1163_s13 = smov %s768_s14  ;;  %s1164_s14 = smov %s838_s21 }
 0x232   : > { %s1165_s15 = smov %s826_s18  ;;  %18 = sbr.rel (!%p16_p4) target bundleno = 5 (0x5), region = 83 }
 0x239   :  { %525 = vsyncpa [#allocation3], 1 }
 0x23a   :  { %527 = vsyncpa [#allocation3 + $0x1], 1 }
 0x23b   :  { %528 = vsyncpa [#allocation4], 1 }
 0x23c   :  { %530 = vsyncpa [#allocation4 + $0x1], 1 }

</bundles_post_ra>
